<compile_context>
chip_gen: v7x
topology: tpu7x:2x2x1
jax: 0.10.0
libtpu: 0.0.40
codegen_flags: <defaults>
</compile_context>

<pallas_src>
import functools

import jax
import jax.numpy as jnp
from jax import lax
from jax.experimental import pallas as pl
from jax.experimental.pallas import tpu as pltpu

_EPS = 1e-5
_LANES = 128


def _apply_trans(y, trans):
    if trans == "relu":
        return jnp.maximum(y, 0.0)
    if trans == "tanh":
        return jnp.tanh(y)
    if trans == "sigmoid":
        return jax.nn.sigmoid(y)
    if trans == "silu":
        return y * jax.nn.sigmoid(y)
    if trans == "mish":
        return y * jnp.tanh(jax.nn.softplus(y))
    if trans is None or trans is False:
        return y
    raise ValueError(f"unsupported trans: {trans}")


def _ln_act_kernel(x_ref, gamma_ref, beta_ref, o_ref, *, trans):
    """LayerNorm over the (full, lane-mapped) last dim + activation."""
    x = x_ref[...].astype(jnp.float32)
    mean = jnp.mean(x, axis=-1, keepdims=True)
    xc = x - mean
    var = jnp.mean(xc * xc, axis=-1, keepdims=True)
    y = xc * lax.rsqrt(var + _EPS)
    y = y * gamma_ref[...] + beta_ref[...]
    o_ref[...] = _apply_trans(y, trans).astype(o_ref.dtype)


def _ln_act_packed_kernel(x_ref, gamma_ref, beta_ref, seg_ref, o_ref, *,
                          trans, inv_d):
    """Segmented LayerNorm: each 128-lane row packs G logical rows of width D.

    Per-segment sums are a matmul with a 0/1 block-diagonal segment matrix;
    the MXU is otherwise idle in this streaming kernel, so the segmented
    reduction is effectively free and all loads/stores stay lane-dense.
    """
    x = x_ref[...].astype(jnp.float32)
    seg = seg_ref[...]
    mean = jnp.dot(x, seg, preferred_element_type=jnp.float32,
                   precision=lax.Precision.HIGHEST) * inv_d
    xc = x - mean
    var = jnp.dot(xc * xc, seg, preferred_element_type=jnp.float32,
                  precision=lax.Precision.HIGHEST) * inv_d
    y = xc * lax.rsqrt(var + _EPS)
    y = y * gamma_ref[...] + beta_ref[...]
    o_ref[...] = _apply_trans(y, trans).astype(o_ref.dtype)


def _select_block_rows(n_rows, lane_width, itemsize):
    # Sublane packing granularity: 8 for 4-byte, 16 for 2-byte, 32 for 1-byte.
    sublane = max(8, 32 // itemsize)
    # Budget for the 2x double-buffered (in + out) tiles: 24 MiB total keeps
    # us inside v7x's 64 MiB physical VMEM while being far past the tile size
    # where a memory-bound kernel reaches ~85% of HBM roofline.
    tile_budget = 24 * 1024 * 1024
    max_rows = tile_budget // (4 * lane_width * itemsize)
    max_rows = max(sublane, (max_rows // sublane) * sublane)
    # Keep the grid multi-step so v7x's two TensorCores both get work and the
    # software pipeline has iterations to overlap DMA with compute.
    target_steps = 8
    want = -(-n_rows // target_steps)
    want = -(-want // sublane) * sublane
    return max(sublane, min(max_rows, want))


def layer1d_forward(x, gamma, beta, *, trans="silu", block_rows=None):
    """LayerNorm(D) + activation for x of shape (N, D)."""
    N, D = x.shape
    out_dtype = x.dtype
    itemsize = jnp.dtype(x.dtype).itemsize

    # Pack G small rows per 128-lane row when D is a small divisor of 128 so
    # stores are unmasked and no vreg lanes are wasted.
    if D < _LANES and _LANES % D == 0:
        G = _LANES // D
    else:
        G = 1
    L = G * D

    n_rows = -(-N // G)  # packed rows needed
    if block_rows is None:
        tb = _select_block_rows(n_rows, L, itemsize)
    else:
        sublane = max(8, 32 // itemsize)
        tb = max(sublane, -(-block_rows // sublane) * sublane)

    rows_padded = -(-n_rows // tb) * tb
    n_padded = rows_padded * G
    if n_padded != N:
        x = jnp.pad(x, ((0, n_padded - N), (0, 0)))
    xp = x.reshape(rows_padded, L)

    # gamma/beta: f32 cast hoisted out of the kernel; constant index_map keeps
    # them VMEM-resident across grid steps.
    gamma_f = jnp.tile(gamma.astype(jnp.float32).reshape(1, D), (1, G))
    beta_f = jnp.tile(beta.astype(jnp.float32).reshape(1, D), (1, G))

    in_specs = [
        pl.BlockSpec((tb, L), lambda i: (i, 0)),
        pl.BlockSpec((1, L), lambda i: (0, 0)),
        pl.BlockSpec((1, L), lambda i: (0, 0)),
    ]
    operands = [xp, gamma_f, beta_f]

    if G > 1:
        seg_id = jnp.arange(L, dtype=jnp.int32) // D
        seg = (seg_id[:, None] == seg_id[None, :]).astype(jnp.float32)
        in_specs.append(pl.BlockSpec((L, L), lambda i: (0, 0)))
        operands.append(seg)
        kernel = functools.partial(_ln_act_packed_kernel, trans=trans,
                                   inv_d=1.0 / D)
    else:
        kernel = functools.partial(_ln_act_kernel, trans=trans)

    # Explicit scoped-VMEM budget: double-buffered in+out tiles + params.
    tile_bytes = tb * L * itemsize
    vmem_need = 4 * tile_bytes + 4 * L * 4 + (2 * L * L * 4 if G > 1 else 0)
    vmem_limit = int(min(64 * 1024 * 1024,
                         max(32 * 1024 * 1024, 2 * vmem_need)))

    out = pl.pallas_call(
        kernel,
        out_shape=jax.ShapeDtypeStruct((rows_padded, L), out_dtype),
        grid_spec=pltpu.PrefetchScalarGridSpec(
            num_scalar_prefetch=0,
            grid=(rows_padded // tb,),
            in_specs=in_specs,
            out_specs=pl.BlockSpec((tb, L), lambda i: (i, 0)),
        ),
        compiler_params=pltpu.CompilerParams(
            dimension_semantics=("parallel",),
            vmem_limit_bytes=vmem_limit,
        ),
    )(*operands)

    out = out.reshape(n_padded, D)
    if n_padded != N:
        out = out[:N]
    return out


def _reference(x, gamma, beta, trans="silu"):
    xf = x.astype(jnp.float32)
    mean = jnp.mean(xf, axis=-1, keepdims=True)
    var = jnp.mean((xf - mean) ** 2, axis=-1, keepdims=True)
    y = (xf - mean) / jnp.sqrt(var + _EPS) * gamma + beta
    return _apply_trans(y, trans).astype(x.dtype)


if __name__ == "__main__":
    key = jax.random.PRNGKey(0)

    # Deterministic LayerNorm params matching torch defaults (ones / zeros).
    # Case 1: the module's small demo shape (D=32 < 128 -> packed, lane-dense).
    N1, D1 = 8, 32
    x1 = jax.random.normal(key, (N1, D1), dtype=jnp.float32)
    g1 = jnp.ones((D1,), jnp.float32)
    b1 = jnp.zeros((D1,), jnp.float32)
    out1 = jax.block_until_ready(layer1d_forward(x1, g1, b1, trans="silu"))
    ref1 = _reference(x1, g1, b1, "silu")
    assert out1.shape == (N1, D1)
    assert jnp.allclose(out1, ref1, atol=1e-5, rtol=1e-5), "mismatch (packed path)"

    # Case 2: lane-dense D, N not a multiple of the auto tile (padding path).
    N2, D2 = 96, 256
    k2 = jax.random.PRNGKey(1)
    x2 = jax.random.normal(k2, (N2, D2), dtype=jnp.float32)
    g2 = jnp.ones((D2,), jnp.float32)
    b2 = jnp.zeros((D2,), jnp.float32)
    out2 = jax.block_until_ready(layer1d_forward(x2, g2, b2, trans="silu"))
    ref2 = _reference(x2, g2, b2, "silu")
    assert out2.shape == (N2, D2)
    assert jnp.allclose(out2, ref2, atol=1e-5, rtol=1e-5), "mismatch (general path)"

    print("KERNEL_OK")
</pallas_src>

<mosaic_0001>
module attributes {stable_mosaic.version = 11 : i64} {
  func.func @_ln_act_packed_kernel(%arg0: i32, %arg1: memref<8x128xf32, #tpu.memory_space<vmem>>, %arg2: memref<1x128xf32, #tpu.memory_space<vmem>>, %arg3: memref<1x128xf32, #tpu.memory_space<vmem>>, %arg4: memref<128x128xf32, #tpu.memory_space<vmem>>, %arg5: memref<8x128xf32, #tpu.memory_space<vmem>>) attributes {dimension_semantics = [#tpu.dimension_semantics<parallel>], iteration_bounds = array<i64: 1>, scalar_prefetch = 0 : i64, scratch_operands = 0 : i64, tpu.core_type = #tpu.core_type<tc>, window_params = [{transform_indices = @transform_0, window_bounds = array<i64: 8, 128>}, {pipeline_mode = #tpu.pipeline_mode<synchronous>, transform_indices = @transform_1, window_bounds = array<i64: 1, 128>}, {pipeline_mode = #tpu.pipeline_mode<synchronous>, transform_indices = @transform_2, window_bounds = array<i64: 1, 128>}, {pipeline_mode = #tpu.pipeline_mode<synchronous>, transform_indices = @transform_3, window_bounds = array<i64: 128, 128>}, {transform_indices = @transform_4, window_bounds = array<i64: 8, 128>}]} {
    %c0 = arith.constant 0 : index
    %c0_0 = arith.constant 0 : index
    %0 = vector.load %arg1[%c0, %c0_0] : memref<8x128xf32, #tpu.memory_space<vmem>>, vector<8x128xf32>
    %c0_1 = arith.constant 0 : index
    %c0_2 = arith.constant 0 : index
    %1 = vector.load %arg4[%c0_1, %c0_2] : memref<128x128xf32, #tpu.memory_space<vmem>>, vector<128x128xf32>
    %cst = arith.constant dense<0.000000e+00> : vector<8x128xf32>
    %2 = tpu.matmul %0, %1, %cst {dimension_numbers = #tpu.dot_dimension_numbers<[1], [0], [0], [1], [0, 0, 1, 1], [], []>, precision = #tpu.contract_precision<fp32>} : vector<8x128xf32>, vector<128x128xf32>, vector<8x128xf32> -> vector<8x128xf32>
    %cst_3 = arith.constant 3.125000e-02 : f32
    %3 = vector.broadcast %cst_3 : f32 to vector<8x128xf32>
    %4 = arith.mulf %2, %3 : vector<8x128xf32>
    %5 = arith.subf %0, %4 : vector<8x128xf32>
    %6 = arith.mulf %5, %5 : vector<8x128xf32>
    %cst_4 = arith.constant dense<0.000000e+00> : vector<8x128xf32>
    %7 = tpu.matmul %6, %1, %cst_4 {dimension_numbers = #tpu.dot_dimension_numbers<[1], [0], [0], [1], [0, 0, 1, 1], [], []>, precision = #tpu.contract_precision<fp32>} : vector<8x128xf32>, vector<128x128xf32>, vector<8x128xf32> -> vector<8x128xf32>
    %cst_5 = arith.constant 3.125000e-02 : f32
    %8 = vector.broadcast %cst_5 : f32 to vector<8x128xf32>
    %9 = arith.mulf %7, %8 : vector<8x128xf32>
    %cst_6 = arith.constant 9.99999974E-6 : f32
    %10 = vector.broadcast %cst_6 : f32 to vector<8x128xf32>
    %11 = arith.addf %9, %10 : vector<8x128xf32>
    %12 = math.rsqrt %11 : vector<8x128xf32>
    %13 = arith.mulf %5, %12 : vector<8x128xf32>
    %c0_7 = arith.constant 0 : index
    %c0_8 = arith.constant 0 : index
    %14 = vector.load %arg2[%c0_7, %c0_8] : memref<1x128xf32, #tpu.memory_space<vmem>>, vector<1x128xf32>
    %15 = vector.broadcast %14 : vector<1x128xf32> to vector<8x128xf32>
    %16 = arith.mulf %13, %15 : vector<8x128xf32>
    %c0_9 = arith.constant 0 : index
    %c0_10 = arith.constant 0 : index
    %17 = vector.load %arg3[%c0_9, %c0_10] : memref<1x128xf32, #tpu.memory_space<vmem>>, vector<1x128xf32>
    %18 = vector.broadcast %17 : vector<1x128xf32> to vector<8x128xf32>
    %19 = arith.addf %16, %18 : vector<8x128xf32>
    %20 = arith.negf %19 : vector<8x128xf32>
    %21 = math.exp %20 : vector<8x128xf32>
    %cst_11 = arith.constant 1.000000e+00 : f32
    %22 = vector.broadcast %cst_11 : f32 to vector<8x128xf32>
    %23 = arith.addf %22, %21 : vector<8x128xf32>
    %24 = arith.divf %22, %23 : vector<8x128xf32>
    %25 = arith.mulf %19, %24 : vector<8x128xf32>
    %c0_12 = arith.constant 0 : index
    %c0_13 = arith.constant 0 : index
    %26 = vector.load %arg5[%c0_12, %c0_13] : memref<8x128xf32, #tpu.memory_space<vmem>>, vector<8x128xf32>
    tpu.vector_store %arg5[%c0_12, %c0_13], %25 {strides = array<i32>} : memref<8x128xf32, #tpu.memory_space<vmem>>, vector<8x128xf32>,
    return
  }
  func.func @transform_0(%arg0: i32) -> (i32, i32) {
    %c0_i32 = arith.constant 0 : i32
    %c0_i32_0 = arith.constant 0 : i32
    return %arg0, %c0_i32 : i32, i32
  }
  func.func @transform_1(%arg0: i32) -> (i32, i32) {
    %c0_i32 = arith.constant 0 : i32
    %c0_i32_0 = arith.constant 0 : i32
    %c0_i32_1 = arith.constant 0 : i32
    return %c0_i32, %c0_i32_0 : i32, i32
  }
  func.func @transform_2(%arg0: i32) -> (i32, i32) {
    %c0_i32 = arith.constant 0 : i32
    %c0_i32_0 = arith.constant 0 : i32
    %c0_i32_1 = arith.constant 0 : i32
    return %c0_i32, %c0_i32_0 : i32, i32
  }
  func.func @transform_3(%arg0: i32) -> (i32, i32) {
    %c0_i32 = arith.constant 0 : i32
    %c0_i32_0 = arith.constant 0 : i32
    %c0_i32_1 = arith.constant 0 : i32
    return %c0_i32, %c0_i32_0 : i32, i32
  }
  func.func @transform_4(%arg0: i32) -> (i32, i32) {
    %c0_i32 = arith.constant 0 : i32
    %c0_i32_0 = arith.constant 0 : i32
    return %arg0, %c0_i32 : i32, i32
  }
}

</mosaic_0001>

<bundles_post_ra>
// kernel: tpu_custom_call.1
= control target key start
LH: loop header
LB: loop body
LE: loop exit
PB: predicated region body
PF: predicated region fallthrough
CT: control target
= control target key end

     0   :  { %9 = vsyncpa [#allocation3], 0  ;;  %s2884_s0 = inlined_call_operand.hbm [shape: f32[8,128], index: 0, kind: input, shape index: {}]   ;;  %s2885_s1 = inlined_call_operand.vmem [shape: f32[1,128], index: 1, kind: input, shape index: {}]   ;;  %s2886_s2 = inlined_call_operand.vmem [shape: f32[1,128], index: 2, kind: input, shape index: {}]   ;;  %s2887_s3 = inlined_call_operand.hbm [shape: f32[128,128], index: 3, kind: input, shape index: {}]   ;;  %s2888_s4 = inlined_call_operand.hbm [shape: f32[8,128], index: 4, kind: output, shape index: {}]  }
   0x1   :  { %10 = vsyncpa [#allocation6], 0 }
   0x2   :  { %11 = vsyncpa [#allocation4], 0  ;;  %s2411_s15 = smov [#allocation2]   ;;  %s2412_s17 = smov [#allocation5]  }
   0x3   :  { %s18_s16 = sshll.u32 %s2411_s15, 4  ;;  %s31_s18 = sshll.u32 %s2412_s17, 4  ;;  %s19_s16 = int_to_ptr.vmem [resolvable:$true] %s18_s16  ;;  %s2444_s18 = int_to_ptr.vmem [resolvable:$true] %s31_s18 }
   0x4   :  { %s2339_s21 = scalar_lea.hbm %s2884_s0, 128 }
   0x5   :  { %p2340_p0 = scmp.ne.s32.totalorder %s2884_s0, %s2339_s21  ;;  %p2343_p1 = scmp.lt.u32.totalorder %s2339_s21, %s2884_s0 }
   0x7   :  { %p2345_p2 = pnand %p2343_p1, %p2340_p0 }
   0x9   :  { %2348 = shalt.err (!%p2345_p2)
}
   0xa   :  { %s2349_s26 = scalar_lea.vmem %s19_s16, 128  ;;  %p2354_p4 = scmp.lt.s32.totalorder %s19_s16, %s19_s16 }
   0xb   :  { %p2350_p3 = scmp.ne.s32.totalorder %s19_s16, %s2349_s26  ;;  %p2355_p5 = scmp.lt.s32.totalorder %s2349_s26, %s2349_s26 }
   0xd   :  { %p2356_p6 = por %p2355_p5, %p2354_p4 }
   0xf   :  { %p2357_p7 = pnand %p2356_p6, %p2350_p3 }
  0x11   :  { %2360 = shalt.err (!%p2357_p7)
}
  0x12   :  { %21 = dma.hbm_to_vmem [thread:$0]  %s2884_s0, 128, %s19_s16, [#allocation3]  }
  0x13   :  { %s2361_s5 = scalar_lea.hbm %s2887_s3, 2048 }
  0x14   :  { %p2362_p8 = scmp.ne.s32.totalorder %s2887_s3, %s2361_s5  ;;  %p2365_p9 = scmp.lt.u32.totalorder %s2361_s5, %s2887_s3 }
  0x16   :  { %p2367_p10 = pnand %p2365_p9, %p2362_p8 }
  0x18   :  { %2370 = shalt.err (!%p2367_p10)
}
  0x19   :  { %s2371_s10 = scalar_lea.vmem %s2444_s18, 2048  ;;  %p2376_p12 = scmp.lt.s32.totalorder %s2444_s18, %s2444_s18 }
  0x1a   :  { %p2372_p11 = scmp.ne.s32.totalorder %s2444_s18, %s2371_s10  ;;  %p2377_p13 = scmp.lt.s32.totalorder %s2371_s10, %s2371_s10 }
  0x1c   :  { %p2378_p0 = por %p2377_p13, %p2376_p12 }
  0x1e   :  { %p2379_p1 = pnand %p2378_p0, %p2372_p11 }
  0x20   :  { %2382 = shalt.err (!%p2379_p1)
}
  0x21   :  { %s2413_s0 = smov 128   ;;  %s2414_s11 = smov 8  }
  0x22   :  { %37 = dma.hbm_to_vmem [thread:$0]  %s2887_s3, 2048, %s2444_s18, [#allocation6], %s2413_s0, %s2413_s0, %s2414_s11  }
  0x23   :  { %2405 = dma.done.wait [#allocation3], 128  }
  0x24   :  { %2406 = vsyncadd [#allocation3], 4294967168 }
  0x25   :  { %2407 = dma.done.wait [#allocation6], 2048  }
  0x26   :  { %2408 = vsyncadd [#allocation6], 4294965248  ;;  %v2415_v0 = vmov 0.0|0.0   ;;  %vm2416_vm0 = vmmov 0   ;;  %v2417_v1 = vmov 0.0   ;;  %v45_v2 = vld [vmem:[#allocation5] sm:$0xff] }
  0x27   :  { %2017 = vmatprep.subr.bf16.mxu0 %v2415_v0  ;;  %1629 = vmatprep.mubr.msk.f32.mxu0 %vm2416_vm0, %v2417_v1  ;;  %v46_v3 = vld [vmem:[#allocation5 + $0x8] sm:$0xff]  ;;  %v47_v4 = vld [vmem:[#allocation5 + $0x10] sm:$0xff]  ;;  %v62_v5 = vand.u32 4294901760, %v45_v2  ;;  %v48_v7 = vld [vmem:[#allocation5 + $0x18] sm:$0xff]  ;;  %s2418_s17 = smov [#allocation7]  }
  0x28   :  { %2161 = vmatprep.subr.bf16.mxu1 %v2415_v0  ;;  %1839 = vmatprep.mubr.msk.f32.mxu1 %vm2416_vm0, %v2417_v1  ;;  %v65_v6 = vand.u32 4294901760, %v46_v3  ;;  %v68_v8 = vand.u32 4294901760, %v47_v4  ;;  %v71_v9 = vand.u32 4294901760, %v48_v7  ;;  %v49_v10 = vld [vmem:[#allocation5 + $0x20] sm:$0xff]  ;;  %v50_v11 = vld [vmem:[#allocation5 + $0x28] sm:$0xff]  ;;  %v51_v16 = vld [vmem:[#allocation5 + $0x30] sm:$0xff] }
  0x29   :  { %v74_v14 = vand.u32 4294901760, %v49_v10  ;;  %v77_v15 = vand.u32 4294901760, %v50_v11  ;;  %v52_v17 = vld [vmem:[#allocation5 + $0x38] sm:$0xff]  ;;  %v80_v19 = vand.u32 4294901760, %v51_v16  ;;  %v53_v21 = vld [vmem:[#allocation5 + $0x40] sm:$0xff]  ;;  %v54_v23 = vld [vmem:[#allocation5 + $0x48] sm:$0xff]  ;;  %v2503_v34 = vsub.f32 %v45_v2, %v62_v5 }
  0x2a   :  { %v2481_v12 = vpack.c.bf16 %v65_v6, %v62_v5  ;;  %v2484_v13 = vpack.c.bf16 %v71_v9, %v68_v8  ;;  %v83_v20 = vand.u32 4294901760, %v52_v17  ;;  %v2492_v22 = vld [vmem:[#allocation2] sm:$0xff]  ;;  %v55_v24 = vld [vmem:[#allocation5 + $0x50] sm:$0xff]  ;;  %v57_v26 = vld [vmem:[#allocation5 + $0x60] sm:$0xff]  ;;  %v86_v27 = vand.u32 4294901760, %v53_v21  ;;  %s1380_s18 = sshll.u32 %s2418_s17, 4  ;;  %s1381_s18 = int_to_ptr.vmem [resolvable:$true] %s1380_s18 }
  0x2b   :  { %v2490_v18 = vpack.c.bf16 %v77_v15, %v74_v14  ;;  %v56_v25 = vld [vmem:[#allocation5 + $0x58] sm:$0xff]  ;;  %v58_v28 = vld [vmem:[#allocation5 + $0x68] sm:$0xff]  ;;  %v59_v29 = vld [vmem:[#allocation5 + $0x70] sm:$0xff]  ;;  %v2498_v31 = vand.u32 4294901760, %v2492_v22  ;;  %v89_v33 = vand.u32 4294901760, %v54_v23  ;;  %v2505_v35 = vsub.f32 %v46_v3, %v65_v6  ;;  %p2388_p3 = scmp.lt.s32.totalorder %s1381_s18, %s1381_s18 }
  0x2c   :  { %2019 = vmatpush3.bf16.msra.mxu0 %v2481_v12  ;;  %2163 = vmatpush3.bf16.msra.mxu1 %v2481_v12  ;;  %v60_v30 = vld [vmem:[#allocation5 + $0x78] sm:$0xff]  ;;  %v2501_v32 = vpack.c.bf16 %v83_v20, %v80_v19  ;;  %v92_v36 = vand.u32 4294901760, %v55_v24  ;;  %v95_v37 = vand.u32 4294901760, %v56_v25  ;;  %v98_v38 = vand.u32 4294901760, %v57_v26 }
  0x2d   :  { %2020 = vmatprep.subr.bf16.mxu0 %v2415_v0  ;;  %2164 = vmatprep.subr.bf16.mxu1 %v2415_v0  ;;  %v101_v39 = vand.u32 4294901760, %v58_v28  ;;  %v104_v40 = vand.u32 4294901760, %v59_v29  ;;  %v107_v41 = vand.u32 4294901760, %v60_v30  ;;  %v2512_v42 = vsub.f32 %v2492_v22, %v2498_v31 }
  0x2e   :  { %v2514_v43 = vsub.f32 %v47_v4, %v68_v8  ;;  %v2517_v44 = vpack.c.bf16 %v89_v33, %v86_v27  ;;  %v155_v45 = vand.u32 4294901760, %v2503_v34  ;;  %v162_v46 = vand.u32 4294901760, %v2505_v35 }
  0x2f   :  { %v2521_v47 = vsub.f32 %v48_v7, %v71_v9  ;;  %v2525_v48 = vsub.f32 %v49_v10, %v74_v14  ;;  %v2528_v49 = vpack.c.bf16 %v95_v37, %v92_v36  ;;  %v2530_v50 = vpack.c.bf16 %v101_v39, %v98_v38 }
  0x30   :  { %2022 = vmatpush3.bf16.msra.mxu0 %v2484_v13  ;;  %2166 = vmatpush3.bf16.msra.mxu1 %v2484_v13  ;;  %v2532_v51 = vpack.c.bf16 %v107_v41, %v104_v40  ;;  %v144_v52 = vand.u32 4294901760, %v2512_v42  ;;  %v169_v53 = vand.u32 4294901760, %v2514_v43  ;;  %v2536_v54 = vsub.f32 %v50_v11, %v77_v15 }
  0x31   :  { %2023 = vmatprep.subr.bf16.mxu0 %v2415_v0  ;;  %2167 = vmatprep.subr.bf16.mxu1 %v2415_v0  ;;  %v2538_v55 = vsub.f32 %v51_v16, %v80_v19  ;;  %v156_v56 = vsub.f32 %v2503_v34, %v155_v45  ;;  %v163_v57 = vsub.f32 %v2505_v35, %v162_v46  ;;  %v176_v58 = vand.u32 4294901760, %v2521_v47 }
  0x32   :  { %v2544_v59 = vsub.f32 %v52_v17, %v83_v20  ;;  %v183_v60 = vand.u32 4294901760, %v2525_v48  ;;  %v2549_v61 = vsub.f32 %v53_v21, %v86_v27  ;;  %v2551_v62 = vsub.f32 %v54_v23, %v89_v33 }
  0x33   :  { %v2553_v63 = vsub.f32 %v55_v24, %v92_v36  ;;  %v2556_v2 = vsub.f32 %v56_v25, %v95_v37  ;;  %v2558_v3 = vsub.f32 %v57_v26, %v98_v38  ;;  %v2560_v4 = vsub.f32 %v58_v28, %v101_v39 }
  0x34   :  { %2025 = vmatpush3.bf16.msra.mxu0 %v2490_v18  ;;  %2169 = vmatpush3.bf16.msra.mxu1 %v2490_v18  ;;  %v2562_v5 = vsub.f32 %v59_v29, %v104_v40  ;;  %v145_v6 = vsub.f32 %v2512_v42, %v144_v52  ;;  %v170_v7 = vsub.f32 %v2514_v43, %v169_v53  ;;  %v190_v8 = vand.u32 4294901760, %v2536_v54 }
  0x35   :  { %2026 = vmatprep.subr.bf16.mxu0 %v2415_v0  ;;  %2170 = vmatprep.subr.bf16.mxu1 %v2415_v0  ;;  %v2569_v9 = vsub.f32 %v60_v30, %v107_v41  ;;  %v157_v10 = vand.u32 4294901760, %v156_v56  ;;  %v164_v11 = vand.u32 4294901760, %v163_v57  ;;  %v177_v14 = vsub.f32 %v2521_v47, %v176_v58 }
  0x36   :  { %v197_v15 = vand.u32 4294901760, %v2538_v55  ;;  %v204_v16 = vand.u32 4294901760, %v2544_v59  ;;  %v211_v17 = vand.u32 4294901760, %v2549_v61  ;;  %v218_v19 = vand.u32 4294901760, %v2551_v62 }
  0x37   :  { %v225_v20 = vand.u32 4294901760, %v2553_v63  ;;  %v232_v21 = vand.u32 4294901760, %v2556_v2  ;;  %v239_v23 = vand.u32 4294901760, %v2558_v3  ;;  %v246_v24 = vand.u32 4294901760, %v2560_v4 }
  0x38   :  { %2028 = vmatpush3.bf16.msra.mxu0 %v2501_v32  ;;  %2172 = vmatpush3.bf16.msra.mxu1 %v2501_v32  ;;  %v253_v25 = vand.u32 4294901760, %v2562_v5  ;;  %v260_v26 = vand.u32 4294901760, %v2569_v9  ;;  %v2586_v27 = vpack.c.bf16 %v162_v46, %v155_v45  ;;  %v2588_v28 = vpack.c.bf16 %v176_v58, %v169_v53 }
  0x39   :  { %2029 = vmatprep.subr.bf16.mxu0 %v2415_v0  ;;  %2173 = vmatprep.subr.bf16.mxu1 %v2415_v0  ;;  %v2590_v29 = vpack.c.bf16 %v190_v8, %v183_v60  ;;  %v2593_v30 = vpack.c.bf16 %v204_v16, %v197_v15  ;;  %v2595_v33 = vpack.c.bf16 %v218_v19, %v211_v17  ;;  %v146_v39 = vand.u32 4294901760, %v145_v6 }
  0x3a   :  { %v2597_v36 = vpack.c.bf16 %v232_v21, %v225_v20  ;;  %v2599_v37 = vpack.c.bf16 %v246_v24, %v239_v23  ;;  %v2602_v38 = vpack.c.bf16 %v260_v26, %v253_v25  ;;  %v184_v40 = vsub.f32 %v2525_v48, %v183_v60 }
  0x3b   :  { %v2608_v41 = vpack.c.bf16 %v164_v11, %v157_v10  ;;  %v171_v45 = vand.u32 4294901760, %v170_v7  ;;  %v178_v46 = vand.u32 4294901760, %v177_v14  ;;  %v191_v53 = vsub.f32 %v2536_v54, %v190_v8 }
  0x3c   :  { %2031 = vmatpush3.bf16.msra.mxu0 %v2517_v44  ;;  %2175 = vmatpush3.bf16.msra.mxu1 %v2517_v44  ;;  %v198_v56 = vsub.f32 %v2538_v55, %v197_v15  ;;  %v185_v58 = vand.u32 4294901760, %v184_v40  ;;  %v205_v6 = vsub.f32 %v2544_v59, %v204_v16  ;;  %v212_v11 = vsub.f32 %v2549_v61, %v211_v17 }
  0x3d   :  { %2032 = vmatprep.subr.bf16.mxu0 %v2415_v0  ;;  %2176 = vmatprep.subr.bf16.mxu1 %v2415_v0  ;;  %v2616_v57 = vpack.c.bf16 %v178_v46, %v171_v45  ;;  %v192_v60 = vand.u32 4294901760, %v191_v53  ;;  %v219_v14 = vsub.f32 %v2551_v62, %v218_v19  ;;  %v226_v15 = vsub.f32 %v2553_v63, %v225_v20 }
  0x3e   :  { %v199_v7 = vand.u32 4294901760, %v198_v56  ;;  %v206_v10 = vand.u32 4294901760, %v205_v6  ;;  %v233_v45 = vsub.f32 %v2556_v2, %v232_v21  ;;  %v240_v46 = vsub.f32 %v2558_v3, %v239_v23 }
  0x3f   :  { %v2623_v8 = vpack.c.bf16 %v192_v60, %v185_v58  ;;  %v220_v40 = vand.u32 4294901760, %v219_v14  ;;  %v227_v19 = vand.u32 4294901760, %v226_v15  ;;  %v247_v20 = vsub.f32 %v2560_v4, %v246_v24 }
  0x40   :  { %2034 = vmatpush3.bf16.msra.mxu0 %v2528_v49  ;;  %2178 = vmatpush3.bf16.msra.mxu1 %v2528_v49  ;;  %v2630_v16 = vpack.c.bf16 %v206_v10, %v199_v7  ;;  %v234_v53 = vand.u32 4294901760, %v233_v45  ;;  %v254_v56 = vsub.f32 %v2562_v5, %v253_v25  ;;  %v241_v21 = vand.u32 4294901760, %v240_v46 }
  0x41   :  { %2035 = vmatprep.subr.bf16.mxu0 %v2415_v0  ;;  %2179 = vmatprep.subr.bf16.mxu1 %v2415_v0  ;;  %v248_v60 = vand.u32 4294901760, %v247_v20  ;;  %v261_v23 = vsub.f32 %v2569_v9, %v260_v26  ;;  %v2657_v26 = vpack.c.bf16 %v2505_v35, %v2503_v34  ;;  %v2664_v10 = vpack.c.bf16 %v2521_v47, %v2514_v43 }
  0x42   :  { %v2642_v58 = vpack.c.bf16 %v234_v53, %v227_v19  ;;  %v255_v7 = vand.u32 4294901760, %v254_v56  ;;  %v2672_v34 = vpack.c.bf16 %v2536_v54, %v2525_v48  ;;  %v2678_v35 = vpack.c.bf16 %v2544_v59, %v2538_v55 }
  0x43   :  { %v2647_v6 = vpack.c.bf16 %v248_v60, %v241_v21  ;;  %v262_v24 = vand.u32 4294901760, %v261_v23  ;;  %v2684_v43 = vpack.c.bf16 %v2551_v62, %v2549_v61  ;;  %v2690_v47 = vpack.c.bf16 %v2556_v2, %v2553_v63 }
  0x44   :  { %2037 = vmatpush3.bf16.msra.mxu0 %v2530_v50  ;;  %2181 = vmatpush3.bf16.msra.mxu1 %v2530_v50  ;;  %v2696_v48 = vpack.c.bf16 %v2560_v4, %v2558_v3  ;;  %v2702_v54 = vpack.c.bf16 %v2569_v9, %v2562_v5 }
  0x45   :  { %2038 = vmatprep.subr.bf16.mxu0 %v2415_v0  ;;  %2182 = vmatprep.subr.bf16.mxu1 %v2415_v0  ;;  %v2651_v25 = vpack.c.bf16 %v262_v24, %v255_v7 }
  0x48   :  { %2040 = vmatpush3.bf16.msra.mxu0 %v2532_v51  ;;  %2184 = vmatpush3.bf16.msra.mxu1 %v2532_v51 }
  0x49   :  { %2041 = vmatprep.subr.bf16.mxu0 %v2415_v0  ;;  %2185 = vmatprep.subr.bf16.mxu1 %v2415_v0 }
  0x4b   :  { %1630 = vmatmul.mubr.f32.vlgmr.msra.gmra.mrb[0].mxu0 %v146_v39  ;;  %v213_v39 = vand.u32 4294901760, %v212_v11 }
  0x4c   :  { %2043 = vmatpush3.bf16.msra.mxu0 %v2608_v41  ;;  %1664 = vmatprep.mubr.msk.f32.mxu0 %vm2416_vm0, %v2417_v1 }
  0x4d   :  { %2044 = vmatprep.subr.bf16.mxu0 %v2415_v0  ;;  %v2636_v17 = vpack.c.bf16 %v220_v40, %v213_v39 }
  0x50   :  { %2046 = vmatpush3.bf16.msra.mxu0 %v2616_v57 }
  0x51   :  { %2047 = vmatprep.subr.bf16.mxu0 %v2415_v0 }
  0x54   :  { %2049 = vmatpush3.bf16.msra.mxu0 %v2623_v8 }
  0x55   :  { %2050 = vmatprep.subr.bf16.mxu0 %v2415_v0 }
  0x58   :  { %2052 = vmatpush3.bf16.msra.mxu0 %v2630_v16 }
  0x59   :  { %2053 = vmatprep.subr.bf16.mxu0 %v2415_v0 }
  0x5c   :  { %2055 = vmatpush3.bf16.msra.mxu0 %v2636_v17 }
  0x5d   :  { %2056 = vmatprep.subr.bf16.mxu0 %v2415_v0 }
  0x60   :  { %2058 = vmatpush3.bf16.msra.mxu0 %v2642_v58 }
  0x61   :  { %2059 = vmatprep.subr.bf16.mxu0 %v2415_v0 }
  0x64   :  { %2061 = vmatpush3.bf16.msra.mxu0 %v2647_v6 }
  0x65   :  { %2062 = vmatprep.subr.bf16.mxu0 %v2415_v0 }
  0x68   :  { %2064 = vmatpush3.bf16.msra.mxu0 %v2651_v25 }
  0x69   :  { %2065 = vmatprep.subr.bf16.mxu0 %v2415_v0 }
  0x6b   :  { %1665 = vmatmul.mubr.f32.vlgmr.msra.gmra.mrb[0].mxu0 %v2498_v31 }
  0x6c   :  { %2067 = vmatpush3.bf16.msra.mxu0 %v2657_v26  ;;  %1699 = vmatprep.mubr.msk.f32.mxu0 %vm2416_vm0, %v2417_v1 }
  0x6d   :  { %2068 = vmatprep.subr.bf16.mxu0 %v2415_v0 }
  0x70   :  { %2070 = vmatpush3.bf16.msra.mxu0 %v2664_v10 }
  0x71   :  { %2071 = vmatprep.subr.bf16.mxu0 %v2415_v0 }
  0x74   :  { %2073 = vmatpush3.bf16.msra.mxu0 %v2672_v34 }
  0x75   :  { %2074 = vmatprep.subr.bf16.mxu0 %v2415_v0 }
  0x78   :  { %2076 = vmatpush3.bf16.msra.mxu0 %v2678_v35 }
  0x79   :  { %2077 = vmatprep.subr.bf16.mxu0 %v2415_v0 }
  0x7c   :  { %2079 = vmatpush3.bf16.msra.mxu0 %v2684_v43 }
  0x7d   :  { %2080 = vmatprep.subr.bf16.mxu0 %v2415_v0 }
  0x80   :  { %2082 = vmatpush3.bf16.msra.mxu0 %v2690_v47 }
  0x81   :  { %2083 = vmatprep.subr.bf16.mxu0 %v2415_v0 }
  0x84   :  { %2085 = vmatpush3.bf16.msra.mxu0 %v2696_v48 }
  0x85   :  { %2086 = vmatprep.subr.bf16.mxu0 %v2415_v0 }
  0x88   :  { %2088 = vmatpush3.bf16.msra.mxu0 %v2702_v54 }
  0x89   :  { %2089 = vmatprep.subr.bf16.mxu0 %v2415_v0 }
  0x8b   :  { %1700 = vmatmul.mubr.f32.vlgmr.msra.gmra.mrb[0].mxu0 %v2512_v42 }
  0x8c   :  { %2091 = vmatpush3.bf16.msra.mxu0 %v2481_v12  ;;  %1734 = vmatprep.mubr.msk.f32.mxu0 %vm2416_vm0, %v2417_v1 }
  0x8d   :  { %2092 = vmatprep.subr.bf16.mxu0 %v2415_v0 }
  0x90   :  { %2094 = vmatpush3.bf16.msra.mxu0 %v2484_v13 }
  0x91   :  { %2095 = vmatprep.subr.bf16.mxu0 %v2415_v0 }
  0x94   :  { %2097 = vmatpush3.bf16.msra.mxu0 %v2490_v18 }
  0x95   :  { %2098 = vmatprep.subr.bf16.mxu0 %v2415_v0 }
  0x98   :  { %2100 = vmatpush3.bf16.msra.mxu0 %v2501_v32 }
  0x99   :  { %2101 = vmatprep.subr.bf16.mxu0 %v2415_v0 }
  0x9c   :  { %2103 = vmatpush3.bf16.msra.mxu0 %v2517_v44 }
  0x9d   :  { %2104 = vmatprep.subr.bf16.mxu0 %v2415_v0 }
  0xa0   :  { %2106 = vmatpush3.bf16.msra.mxu0 %v2528_v49 }
  0xa1   :  { %2107 = vmatprep.subr.bf16.mxu0 %v2415_v0 }
  0xa4   :  { %2109 = vmatpush3.bf16.msra.mxu0 %v2530_v50 }
  0xa5   :  { %2110 = vmatprep.subr.bf16.mxu0 %v2415_v0 }
  0xa8   :  { %2112 = vmatpush3.bf16.msra.mxu0 %v2532_v51 }
  0xa9   :  { %2113 = vmatprep.subr.bf16.mxu0 %v2415_v0 }
  0xab   :  { %1735 = vmatmul.mubr.f32.vlgmr.msra.gmra.mrb[0].mxu0 %v144_v52 }
  0xac   :  { %2115 = vmatpush3.bf16.msra.mxu0 %v2586_v27  ;;  %1769 = vmatprep.mubr.msk.f32.mxu0 %vm2416_vm0, %v2417_v1 }
  0xad   :  { %2116 = vmatprep.subr.bf16.mxu0 %v2415_v0 }
  0xb0   :  { %2118 = vmatpush3.bf16.msra.mxu0 %v2588_v28 }
  0xb1   :  { %2119 = vmatprep.subr.bf16.mxu0 %v2415_v0 }
  0xb4   :  { %2121 = vmatpush3.bf16.msra.mxu0 %v2590_v29 }
  0xb5   :  { %2122 = vmatprep.subr.bf16.mxu0 %v2415_v0 }
  0xb8   :  { %2124 = vmatpush3.bf16.msra.mxu0 %v2593_v30 }
  0xb9   :  { %2125 = vmatprep.subr.bf16.mxu0 %v2415_v0 }
  0xbc   :  { %2127 = vmatpush3.bf16.msra.mxu0 %v2595_v33 }
  0xbd   :  { %2128 = vmatprep.subr.bf16.mxu0 %v2415_v0 }
  0xc0   :  { %2130 = vmatpush3.bf16.msra.mxu0 %v2597_v36 }
  0xc1   :  { %2131 = vmatprep.subr.bf16.mxu0 %v2415_v0 }
  0xc4   :  { %2133 = vmatpush3.bf16.msra.mxu0 %v2599_v37 }
  0xc5   :  { %2134 = vmatprep.subr.bf16.mxu0 %v2415_v0 }
  0xc8   :  { %2136 = vmatpush3.bf16.msra.mxu0 %v2602_v38 }
  0xc9   :  { %2137 = vmatprep.subr.bf16.mxu0 %v2415_v0 }
  0xcb   :  { %1770 = vmatmul.mubr.f32.vlgmr.msra.gmra.mrb[0].mxu0 %v2498_v31 }
  0xcc   :  { %2139 = vmatpush3.bf16.msra.mxu0 %v2481_v12  ;;  %1804 = vmatprep.mubr.msk.f32.mxu0 %vm2416_vm0, %v2417_v1 }
  0xcd   :  { %2140 = vmatprep.subr.bf16.mxu0 %v2415_v0 }
  0xd0   :  { %2142 = vmatpush3.bf16.msra.mxu0 %v2484_v13 }
  0xd1   :  { %2143 = vmatprep.subr.bf16.mxu0 %v2415_v0 }
  0xd4   :  { %2145 = vmatpush3.bf16.msra.mxu0 %v2490_v18 }
  0xd5   :  { %2146 = vmatprep.subr.bf16.mxu0 %v2415_v0 }
  0xd8   :  { %2148 = vmatpush3.bf16.msra.mxu0 %v2501_v32 }
  0xd9   :  { %2149 = vmatprep.subr.bf16.mxu0 %v2415_v0 }
  0xdc   :  { %2151 = vmatpush3.bf16.msra.mxu0 %v2517_v44 }
  0xdd   :  { %2152 = vmatprep.subr.bf16.mxu0 %v2415_v0 }
  0xe0   :  { %2154 = vmatpush3.bf16.msra.mxu0 %v2528_v49 }
  0xe1   :  { %2155 = vmatprep.subr.bf16.mxu0 %v2415_v0 }
  0xe4   :  { %2157 = vmatpush3.bf16.msra.mxu0 %v2530_v50 }
  0xe5   :  { %2158 = vmatprep.subr.bf16.mxu0 %v2415_v0 }
  0xe8   :  { %2160 = vmatpush3.bf16.msra.mxu0 %v2532_v51 }
  0xeb   :  { %1805 = vmatmul.mubr.f32.vlgmr.msra.gmra.mrb[0].mxu0 %v2498_v31  ;;  %v1390_v31 = vld [vmem:[%s2885_s1] ss:$0 sm:$0xff]  ;;  %s2383_s1 = scalar_lea.vmem %s1381_s18, 128 }
  0xec   :  { %p2384_p2 = scmp.ne.s32.totalorder %s1381_s18, %s2383_s1  ;;  %p2389_p4 = scmp.lt.s32.totalorder %s2383_s1, %s2383_s1 }
  0xee   :  { %p2390_p5 = por %p2389_p4, %p2388_p3 }
  0xf0   :  { %p2391_p6 = pnand %p2390_p5, %p2384_p2 }
 0x1be   :  { %v698_v42 = vpop.f32.mrb[0].mxu0 }
 0x1bf   :  { %v702_v52 = vmul.f32 0.03125, %v698_v42  ;;  %v1806_v55 = vpop.f32.mrb[1].mxu0 }
 0x1c1   :  { %v2766_v59 = vsub.f32 %v2492_v22, %v702_v52 }
 0x1c3   :  { %v704_v61 = vmul.f32 %v2766_v59, %v2766_v59 }
 0x1c5   :  { %v2770_v62 = vand.u32 4294901760, %v704_v61 }
 0x1c7   :  { %v787_v63 = vsub.f32 %v704_v61, %v2770_v62 }
 0x1c9   :  { %v788_v2 = vand.u32 4294901760, %v787_v63 }
 0x1cb   :  { %v789_v3 = vsub.f32 %v787_v63, %v788_v2 }
 0x1cd   :  { %v790_v4 = vand.u32 4294901760, %v789_v3 }
 0x1cf   :  { %1840 = vmatmul.mubr.f32.vlgmr.msra.gmra.mrb[0].mxu1 %v790_v4 }
 0x1d0   :  { %2187 = vmatpush3.bf16.msra.mxu1 %v2608_v41  ;;  %1874 = vmatprep.mubr.msk.f32.mxu1 %vm2416_vm0, %v2417_v1 }
 0x1d1   :  { %2188 = vmatprep.subr.bf16.mxu1 %v2415_v0 }
 0x1d4   :  { %2190 = vmatpush3.bf16.msra.mxu1 %v2616_v57 }
 0x1d5   :  { %2191 = vmatprep.subr.bf16.mxu1 %v2415_v0 }
 0x1d8   :  { %2193 = vmatpush3.bf16.msra.mxu1 %v2623_v8 }
 0x1d9   :  { %2194 = vmatprep.subr.bf16.mxu1 %v2415_v0 }
 0x1dc   :  { %2196 = vmatpush3.bf16.msra.mxu1 %v2630_v16 }
 0x1dd   :  { %2197 = vmatprep.subr.bf16.mxu1 %v2415_v0 }
 0x1e0   :  { %2199 = vmatpush3.bf16.msra.mxu1 %v2636_v17 }
 0x1e1   :  { %2200 = vmatprep.subr.bf16.mxu1 %v2415_v0 }
 0x1e4   :  { %2202 = vmatpush3.bf16.msra.mxu1 %v2642_v58 }
 0x1e5   :  { %2203 = vmatprep.subr.bf16.mxu1 %v2415_v0 }
 0x1e8   :  { %2205 = vmatpush3.bf16.msra.mxu1 %v2647_v6 }
 0x1e9   :  { %2206 = vmatprep.subr.bf16.mxu1 %v2415_v0 }
 0x1ec   :  { %2208 = vmatpush3.bf16.msra.mxu1 %v2651_v25 }
 0x1ed   :  { %2209 = vmatprep.subr.bf16.mxu1 %v2415_v0 }
 0x1ef   :  { %1875 = vmatmul.mubr.f32.vlgmr.msra.gmra.mrb[0].mxu1 %v2770_v62 }
 0x1f0   :  { %2211 = vmatpush3.bf16.msra.mxu1 %v2657_v26  ;;  %1909 = vmatprep.mubr.msk.f32.mxu1 %vm2416_vm0, %v2417_v1 }
 0x1f1   :  { %2212 = vmatprep.subr.bf16.mxu1 %v2415_v0 }
 0x1f4   :  { %2214 = vmatpush3.bf16.msra.mxu1 %v2664_v10 }
 0x1f5   :  { %2215 = vmatprep.subr.bf16.mxu1 %v2415_v0 }
 0x1f8   :  { %2217 = vmatpush3.bf16.msra.mxu1 %v2672_v34 }
 0x1f9   :  { %2218 = vmatprep.subr.bf16.mxu1 %v2415_v0 }
 0x1fc   :  { %2220 = vmatpush3.bf16.msra.mxu1 %v2678_v35 }
 0x1fd   :  { %2221 = vmatprep.subr.bf16.mxu1 %v2415_v0 }
 0x200   :  { %2223 = vmatpush3.bf16.msra.mxu1 %v2684_v43 }
 0x201   :  { %2224 = vmatprep.subr.bf16.mxu1 %v2415_v0 }
 0x204   :  { %2226 = vmatpush3.bf16.msra.mxu1 %v2690_v47 }
 0x205   :  { %2227 = vmatprep.subr.bf16.mxu1 %v2415_v0 }
 0x208   :  { %2229 = vmatpush3.bf16.msra.mxu1 %v2696_v48 }
 0x209   :  { %2230 = vmatprep.subr.bf16.mxu1 %v2415_v0 }
 0x20c   :  { %2232 = vmatpush3.bf16.msra.mxu1 %v2702_v54 }
 0x20d   :  { %2233 = vmatprep.subr.bf16.mxu1 %v2415_v0 }
 0x20f   :  { %1910 = vmatmul.mubr.f32.vlgmr.msra.gmra.mrb[0].mxu1 %v787_v63 }
 0x210   :  { %2235 = vmatpush3.bf16.msra.mxu1 %v2481_v12  ;;  %1944 = vmatprep.mubr.msk.f32.mxu1 %vm2416_vm0, %v2417_v1 }
 0x211   :  { %2236 = vmatprep.subr.bf16.mxu1 %v2415_v0 }
 0x214   :  { %2238 = vmatpush3.bf16.msra.mxu1 %v2484_v13 }
 0x215   :  { %2239 = vmatprep.subr.bf16.mxu1 %v2415_v0 }
 0x218   :  { %2241 = vmatpush3.bf16.msra.mxu1 %v2490_v18 }
 0x219   :  { %2242 = vmatprep.subr.bf16.mxu1 %v2415_v0 }
 0x21c   :  { %2244 = vmatpush3.bf16.msra.mxu1 %v2501_v32 }
 0x21d   :  { %2245 = vmatprep.subr.bf16.mxu1 %v2415_v0 }
 0x220   :  { %2247 = vmatpush3.bf16.msra.mxu1 %v2517_v44 }
 0x221   :  { %2248 = vmatprep.subr.bf16.mxu1 %v2415_v0 }
 0x224   :  { %2250 = vmatpush3.bf16.msra.mxu1 %v2528_v49 }
 0x225   :  { %2251 = vmatprep.subr.bf16.mxu1 %v2415_v0 }
 0x228   :  { %2253 = vmatpush3.bf16.msra.mxu1 %v2530_v50 }
 0x229   :  { %2254 = vmatprep.subr.bf16.mxu1 %v2415_v0 }
 0x22c   :  { %2256 = vmatpush3.bf16.msra.mxu1 %v2532_v51 }
 0x22d   :  { %2257 = vmatprep.subr.bf16.mxu1 %v2415_v0 }
 0x22f   :  { %1945 = vmatmul.mubr.f32.vlgmr.msra.gmra.mrb[0].mxu1 %v788_v2 }
 0x230   :  { %2259 = vmatpush3.bf16.msra.mxu1 %v2586_v27  ;;  %1979 = vmatprep.mubr.msk.f32.mxu1 %vm2416_vm0, %v2417_v1 }
 0x231   :  { %2260 = vmatprep.subr.bf16.mxu1 %v2415_v0 }
 0x234   :  { %2262 = vmatpush3.bf16.msra.mxu1 %v2588_v28 }
 0x235   :  { %2263 = vmatprep.subr.bf16.mxu1 %v2415_v0 }
 0x238   :  { %2265 = vmatpush3.bf16.msra.mxu1 %v2590_v29 }
 0x239   :  { %2266 = vmatprep.subr.bf16.mxu1 %v2415_v0 }
 0x23c   :  { %2268 = vmatpush3.bf16.msra.mxu1 %v2593_v30 }
 0x23d   :  { %2269 = vmatprep.subr.bf16.mxu1 %v2415_v0 }
 0x240   :  { %2271 = vmatpush3.bf16.msra.mxu1 %v2595_v33 }
 0x241   :  { %2272 = vmatprep.subr.bf16.mxu1 %v2415_v0 }
 0x244   :  { %2274 = vmatpush3.bf16.msra.mxu1 %v2597_v36 }
 0x245   :  { %2275 = vmatprep.subr.bf16.mxu1 %v2415_v0 }
 0x248   :  { %2277 = vmatpush3.bf16.msra.mxu1 %v2599_v37 }
 0x249   :  { %2278 = vmatprep.subr.bf16.mxu1 %v2415_v0 }
 0x24c   :  { %2280 = vmatpush3.bf16.msra.mxu1 %v2602_v38 }
 0x24d   :  { %2281 = vmatprep.subr.bf16.mxu1 %v2415_v0 }
 0x24f   :  { %1980 = vmatmul.mubr.f32.vlgmr.msra.gmra.mrb[0].mxu1 %v2770_v62 }
 0x250   :  { %2283 = vmatpush3.bf16.msra.mxu1 %v2481_v12  ;;  %2014 = vmatprep.mubr.msk.f32.mxu1 %vm2416_vm0, %v2417_v1 }
 0x251   :  { %2284 = vmatprep.subr.bf16.mxu1 %v2415_v0 }
 0x254   :  { %2286 = vmatpush3.bf16.msra.mxu1 %v2484_v13 }
 0x255   :  { %2287 = vmatprep.subr.bf16.mxu1 %v2415_v0 }
 0x258   :  { %2289 = vmatpush3.bf16.msra.mxu1 %v2490_v18 }
 0x259   :  { %2290 = vmatprep.subr.bf16.mxu1 %v2415_v0 }
 0x25c   :  { %2292 = vmatpush3.bf16.msra.mxu1 %v2501_v32 }
 0x25d   :  { %2293 = vmatprep.subr.bf16.mxu1 %v2415_v0 }
 0x260   :  { %2295 = vmatpush3.bf16.msra.mxu1 %v2517_v44 }
 0x261   :  { %2296 = vmatprep.subr.bf16.mxu1 %v2415_v0 }
 0x264   :  { %2298 = vmatpush3.bf16.msra.mxu1 %v2528_v49 }
 0x265   :  { %2299 = vmatprep.subr.bf16.mxu1 %v2415_v0 }
 0x268   :  { %2301 = vmatpush3.bf16.msra.mxu1 %v2530_v50 }
 0x269   :  { %2302 = vmatprep.subr.bf16.mxu1 %v2415_v0  ;;  %v1391_v0 = vld [vmem:[%s2886_s2] ss:$0 sm:$0xff] }
 0x26c   :  { %2304 = vmatpush3.bf16.msra.mxu1 %v2532_v51 }
 0x26f   :  { %2015 = vmatmul.mubr.f32.vlgmr.msra.gmra.mrb[0].mxu1 %v2770_v62 }
 0x342   :  { %v1342_v1 = vpop.f32.mrb[0].mxu1 }
 0x343   :  { %v1346_v12 = vmul.f32 0.03125, %v1342_v1  ;;  %v2016_v13 = vpop.f32.mrb[1].mxu1 }
 0x345   :  { %v1347_v18 = vadd.f32 1e-05, %v1346_v12 }
 0x347   :  { %2333 = vrsqrt.f32 %v1347_v18 }
 0x351   :  { %v2334_v22 = vpop.eup %2333 }
 0x352   :  { %v1349_v32 = vmul.f32 %v2334_v22, %v2766_v59 }
 0x354   :  { %v1357_v44 = vmul.f32 %v1390_v31, %v1349_v32 }
 0x356   :  { %v1365_v49 = vadd.f32 %v1391_v0, %v1357_v44 }
 0x358   :  { %v1392_v50 = vmul.f32 -1.442695, %v1365_v49 }
 0x35a   :  { %2335 = vpow2.f32 %v1392_v50 }
 0x364   :  { %v2336_v51 = vpop.eup %2335 }
 0x365   :  { %v1369_v5 = vadd.f32 1.0, %v2336_v51 }
 0x367   :  { %2337 = vrcp.f32 %v1369_v5 }
 0x371   :  { %v2338_v9 = vpop.eup %2337 }
 0x372   :  { %v1372_v27 = vmul.f32 %v2338_v9, %v1365_v49 }
 0x374   :  { %1373 = vst [vmem:[#allocation7] sm:$0xff] %v1372_v27 }
 0x375   :  { %2394 = shalt.err (!%p2391_p6)
}
 0x376   :  { %s2395_s20 = scalar_lea.hbm %s2888_s4, 128 }
 0x377   :  { %p2396_p7 = scmp.ne.s32.totalorder %s2888_s4, %s2395_s20  ;;  %p2399_p8 = scmp.lt.u32.totalorder %s2395_s20, %s2888_s4 }
 0x379   :  { %p2401_p9 = pnand %p2399_p8, %p2396_p7 }
 0x37b   :  { %2404 = shalt.err (!%p2401_p9)
}
 0x37c   :  { %1383 = dma.vmem_to_hbm [thread:$0]  %s1381_s18, 128, %s2888_s4, [#allocation4]  }
 0x37d   :  { %2409 = dma.done.wait [#allocation4], 128  }
 0x37e   :  { %2410 = vsyncadd [#allocation4], 4294967168 }
 0x37f   :  { %1387 = vsyncpa [#allocation3], 1 }
 0x380   :  { %1388 = vsyncpa [#allocation6], 1 }
 0x381   :  { %1389 = vsyncpa [#allocation4], 1 }

</bundles_post_ra>
